<compile_context>
chip_gen: v5e
topology: v5e:2x2
jax: 0.10.0
libtpu: 0.0.40
codegen_flags: <defaults>
</compile_context>

<pallas_src>
import functools

import jax
import jax.numpy as jnp
from jax import lax
from jax.experimental import pallas as pl
from jax.experimental.pallas import tpu as pltpu


def _round_up(x, m):
    return ((x + m - 1) // m) * m


def _conv1d_ln_relu_kernel(x_ref, halo_ref, w_ref, p_ref, o_ref, patches_ref,
                           *, k, halo_p, eps):
    # x_ref      : (1, TILE_T, C_in)   current time tile
    # halo_ref   : (1, HALO_P, C_in)   the HALO_P input rows preceding this tile
    #                                  (clamped to block 0 for the first tile -> zeroed)
    # w_ref      : (k*C_in, C_out)     im2col-folded conv weight
    # p_ref      : (8, C_out) f32      row 0 = conv bias, row 1 = LN gamma, row 2 = LN beta
    # o_ref      : (1, TILE_T, C_out)
    # patches_ref: (TILE_T, k*C_in)    VMEM scratch; fully rewritten every grid step
    tile_t = o_ref.shape[1]
    c_in = x_ref.shape[2]

    t_idx = pl.program_id(1)

    x_tile = x_ref[0]                                           # (TILE_T, C_in)
    halo = halo_ref[0]                                          # (HALO_P, C_in)
    # Causal left padding: the first tile of every batch has no valid halo.
    halo = jnp.where(t_idx == 0, jnp.zeros_like(halo), halo)

    # im2col patch build: output row p, tap j needs input row p + j - (k-1).
    # Negative input rows come from the halo block, the rest from x_tile.  Each tap is
    # one (or two) static-offset stores into the scratch -- no concatenate of k shifted
    # copies of the tile.
    for j in range(k):
        h = min(k - 1 - j, tile_t)                              # rows supplied by halo
        lo, hi = j * c_in, (j + 1) * c_in
        if h > 0:
            s = halo_p - (k - 1 - j)
            patches_ref[0:h, lo:hi] = halo[s:s + h, :]
        if h < tile_t:
            patches_ref[h:tile_t, lo:hi] = x_tile[0:tile_t - h, :]

    # Single MXU contraction over k*C_in; native-dtype operands, f32 accumulation.
    acc = jnp.dot(patches_ref[...], w_ref[...], preferred_element_type=jnp.float32)
    acc = acc + p_ref[0:1, :]                                   # conv bias

    # LayerNorm over channels (exact C_out width everywhere -> no masking needed).
    mean = jnp.mean(acc, axis=-1, keepdims=True)
    centered = acc - mean
    var = jnp.mean(centered * centered, axis=-1, keepdims=True)
    y = centered * lax.rsqrt(var + eps)
    y = y * p_ref[1:2, :] + p_ref[2:3, :]                       # gamma, beta

    # ReLU
    y = jnp.maximum(y, 0.0)

    o_ref[0] = y.astype(o_ref.dtype)


def conv1d_block(x, weight, bias, gamma, beta, *, k, eps=1e-5, tile_t=2048):
    """x: (B, T, C_in); weight: (C_out, C_in, k) [PyTorch layout]; returns (B, T, C_out)."""
    B, T, c_in = x.shape
    c_out = weight.shape[0]
    assert weight.shape == (c_out, c_in, k)

    item = x.dtype.itemsize

    # Causal halo rounded up to a sublane multiple (>= 8): all joins stay 8-row aligned,
    # and k == 1 never produces a zero-sized block.
    halo_p = max(8, _round_up(max(k - 1, 1), 8))

    # Time tile: multiple of halo_p (so the halo block index t*tile_t/halo_p is an
    # integer), capped by a VMEM budget and by round_up(T, halo_p).  T does NOT have to
    # be divisible by tile_t: grid uses cdiv and Pallas handles boundary blocks.
    bytes_per_row = (2 * c_in * item          # x tile (double-buffered)
                     + 2 * c_out * item       # out tile (double-buffered)
                     + k * c_in * item)       # im2col patches scratch
    vmem_tile_budget = 24 << 20
    tile_cap = max(halo_p, (vmem_tile_budget // bytes_per_row) // halo_p * halo_p)
    tile_t = max(halo_p,
                 (min(tile_t, _round_up(T, halo_p), tile_cap) // halo_p) * halo_p)
    n_t = pl.cdiv(T, tile_t)
    r = tile_t // halo_p

    # Fold the PyTorch (C_out, C_in, k) weight to an im2col matrix (k*C_in, C_out):
    #   w_folded[j*C_in + i, o] = weight[o, i, j]
    # Operands stay in the input dtype (bf16 in -> fast v6e/v7x MXU path); f32 accumulate.
    w = jnp.transpose(weight, (2, 1, 0)).reshape(k * c_in, c_out).astype(x.dtype)

    # Pack bias / gamma / beta into one (8, C_out) f32 operand (rows 0..2 used):
    # one DMA descriptor + one buffer instead of three.
    params = jnp.zeros((8, c_out), jnp.float32)
    params = params.at[0].set(bias.astype(jnp.float32))
    params = params.at[1].set(gamma.astype(jnp.float32))
    params = params.at[2].set(beta.astype(jnp.float32))

    kernel = functools.partial(_conv1d_ln_relu_kernel, k=k, halo_p=halo_p, eps=eps)

    cost = pl.CostEstimate(
        flops=2 * B * T * k * c_in * c_out,
        transcendentals=B * T,  # one rsqrt per output row
        bytes_accessed=int(B * T * c_in * item                 # x
                           + B * n_t * halo_p * c_in * item    # overlapping halo reads
                           + B * T * c_out * item              # output
                           + w.size * item + params.size * 4),
    )

    # Actual double-buffered footprint + headroom; safe on v5e/v6e (128 MiB) and
    # v7x (64 MiB physical VMEM).
    vmem_bytes = (2 * tile_t * c_in * item          # x tile
                  + 2 * halo_p * c_in * item        # halo
                  + 2 * k * c_in * c_out * item     # weight
                  + 2 * 8 * c_out * 4               # packed params
                  + 2 * tile_t * c_out * item       # output tile
                  + tile_t * k * c_in * item)       # patches scratch
    vmem_limit = int(min(vmem_bytes + (16 << 20), 64 << 20))

    out = pl.pallas_call(
        kernel,
        out_shape=jax.ShapeDtypeStruct((B, T, c_out), x.dtype),
        grid_spec=pltpu.PrefetchScalarGridSpec(
            num_scalar_prefetch=0,
            grid=(B, n_t),
            in_specs=[
                # Current time tile.
                pl.BlockSpec((1, tile_t, c_in), lambda b, t: (b, t, 0)),
                # Halo: the halo_p rows immediately preceding this tile (overlapping
                # read of the same x array).  Clamped to block 0 when t == 0 and then
                # zeroed in-kernel (causal left padding).
                pl.BlockSpec((1, halo_p, c_in),
                             lambda b, t: (b, jnp.maximum(t * r - 1, 0), 0)),
                pl.BlockSpec((k * c_in, c_out), lambda b, t: (0, 0)),
                pl.BlockSpec((8, c_out), lambda b, t: (0, 0)),
            ],
            # Exact-width output: last dim equals the full array dim (legal even when
            # C_out < 128) -> no padded HBM writes, no external un-pad slice.
            out_specs=pl.BlockSpec((1, tile_t, c_out), lambda b, t: (b, t, 0)),
            scratch_shapes=[pltpu.VMEM((tile_t, k * c_in), x.dtype)],
        ),
        compiler_params=pltpu.CompilerParams(
            # No state carried across T tiles (overlap-window halo), so both grid axes
            # are independent -> both megacore-parallel (uses both v7x TensorCores
            # even when B == 1).
            dimension_semantics=("parallel", "parallel"),
            vmem_limit_bytes=vmem_limit,
        ),
        cost_estimate=cost,
    )(x, x, w, params)

    return out


def _reference(x, weight, bias, gamma, beta, *, k, eps=1e-5):
    """Pure-JAX reference matching the PyTorch forward (BTC=True, norm=True)."""
    B, T, c_in = x.shape
    x_pad = jnp.pad(x, ((0, 0), (k - 1, 0), (0, 0)))
    windows = jnp.stack([x_pad[:, j:j + T, :] for j in range(k)], axis=2)  # (B,T,k,C_in)
    y = jnp.einsum("btji,oij->bto", windows, weight) + bias
    mean = jnp.mean(y, axis=-1, keepdims=True)
    var = jnp.mean((y - mean) ** 2, axis=-1, keepdims=True)
    y = (y - mean) / jnp.sqrt(var + eps) * gamma + beta
    return jnp.maximum(y, 0.0)


if __name__ == "__main__":
    key = jax.random.PRNGKey(0)
    # T=40 with tile_t=16 -> grid (B=2, T_tiles=3): exercises the zeroed first-tile
    # halo, the overlapping halo reads of later tiles, and a partial boundary tile.
    B, T, in_dim, out_dim, k = 2, 40, 8, 32, 15

    kx, kw, kb = jax.random.split(key, 3)
    x = jax.random.normal(kx, (B, T, in_dim), dtype=jnp.float32)

    # Deterministic parameter init (shapes match nn.Conv1d / nn.LayerNorm).
    fan_in = in_dim * k
    bound = 1.0 / (fan_in ** 0.5)
    weight = jax.random.uniform(kw, (out_dim, in_dim, k), jnp.float32, -bound, bound)
    bias = jax.random.uniform(kb, (out_dim,), jnp.float32, -bound, bound)
    gamma = jnp.ones((out_dim,), jnp.float32)   # LayerNorm default init
    beta = jnp.zeros((out_dim,), jnp.float32)

    out = conv1d_block(x, weight, bias, gamma, beta, k=k, tile_t=16)
    out = jax.block_until_ready(out)

    ref = _reference(x, weight, bias, gamma, beta, k=k)
    assert out.shape == (B, T, out_dim)
    assert jnp.allclose(out, ref, atol=1e-4, rtol=1e-4), "mismatch vs reference"

    print("KERNEL_OK")
</pallas_src>

<mosaic_0001>
module attributes {stable_mosaic.version = 11 : i64} {
  func.func @_conv1d_ln_relu_kernel(%arg0: i32, %arg1: i32, %arg2: memref<1x16x8xf32, #tpu.memory_space<vmem>>, %arg3: memref<1x16x8xf32, #tpu.memory_space<vmem>>, %arg4: memref<120x32xf32, #tpu.memory_space<vmem>>, %arg5: memref<8x32xf32, #tpu.memory_space<vmem>>, %arg6: memref<1x16x32xf32, #tpu.memory_space<vmem>>, %arg7: memref<16x120xf32, #tpu.memory_space<vmem>>) attributes {dimension_semantics = [#tpu.dimension_semantics<parallel>, #tpu.dimension_semantics<parallel>], iteration_bounds = array<i64: 2, 3>, scalar_prefetch = 0 : i64, scratch_operands = 1 : i64, tpu.core_type = #tpu.core_type<tc>, window_params = [{transform_indices = @transform_0, window_bounds = array<i64: 1, 16, 8>}, {transform_indices = @transform_1, window_bounds = array<i64: 1, 16, 8>}, {pipeline_mode = #tpu.pipeline_mode<synchronous>, transform_indices = @transform_2, window_bounds = array<i64: 120, 32>}, {pipeline_mode = #tpu.pipeline_mode<synchronous>, transform_indices = @transform_3, window_bounds = array<i64: 8, 32>}, {transform_indices = @transform_4, window_bounds = array<i64: 1, 16, 32>}]} {
    %c0 = arith.constant 0 : index
    %c0_0 = arith.constant 0 : index
    %c0_1 = arith.constant 0 : index
    %0 = vector.load %arg2[%c0, %c0_0, %c0_1] : memref<1x16x8xf32, #tpu.memory_space<vmem>>, vector<1x16x8xf32>
    %1 = vector.shape_cast %0 : vector<1x16x8xf32> to vector<16x8xf32>
    %c0_2 = arith.constant 0 : index
    %c0_3 = arith.constant 0 : index
    %c0_4 = arith.constant 0 : index
    %2 = vector.load %arg3[%c0_2, %c0_3, %c0_4] : memref<1x16x8xf32, #tpu.memory_space<vmem>>, vector<1x16x8xf32>
    %3 = vector.shape_cast %2 : vector<1x16x8xf32> to vector<16x8xf32>
    %c0_i32 = arith.constant 0 : i32
    %4 = arith.cmpi eq, %arg1, %c0_i32 : i32
    %cst = arith.constant 0.000000e+00 : f32
    %5 = vector.broadcast %cst : f32 to vector<16x8xf32>
    %6 = arith.select %4, %5, %3 : vector<16x8xf32>
    %7 = vector.extract_strided_slice %6 {offsets = [2, 0], sizes = [14, 8], strides = [1, 1]} : vector<16x8xf32> to vector<14x8xf32>
    %c0_5 = arith.constant 0 : index
    %c0_6 = arith.constant 0 : index
    %8 = vector.load %arg7[%c0_5, %c0_6] : memref<16x120xf32, #tpu.memory_space<vmem>>, vector<14x8xf32>
    tpu.vector_store %arg7[%c0_5, %c0_6], %7 {strides = array<i32>} : memref<16x120xf32, #tpu.memory_space<vmem>>, vector<14x8xf32>,
    %9 = vector.extract_strided_slice %1 {offsets = [0, 0], sizes = [2, 8], strides = [1, 1]} : vector<16x8xf32> to vector<2x8xf32>
    %c14 = arith.constant 14 : index
    %c0_7 = arith.constant 0 : index
    %10 = vector.load %arg7[%c14, %c0_7] : memref<16x120xf32, #tpu.memory_space<vmem>>, vector<2x8xf32>
    tpu.vector_store %arg7[%c14, %c0_7], %9 {strides = array<i32>} : memref<16x120xf32, #tpu.memory_space<vmem>>, vector<2x8xf32>,
    %11 = vector.extract_strided_slice %6 {offsets = [3, 0], sizes = [13, 8], strides = [1, 1]} : vector<16x8xf32> to vector<13x8xf32>
    %c0_8 = arith.constant 0 : index
    %c8 = arith.constant 8 : index
    %12 = vector.load %arg7[%c0_8, %c8] : memref<16x120xf32, #tpu.memory_space<vmem>>, vector<13x8xf32>
    tpu.vector_store %arg7[%c0_8, %c8], %11 {strides = array<i32>} : memref<16x120xf32, #tpu.memory_space<vmem>>, vector<13x8xf32>,
    %13 = vector.extract_strided_slice %1 {offsets = [0, 0], sizes = [3, 8], strides = [1, 1]} : vector<16x8xf32> to vector<3x8xf32>
    %c13 = arith.constant 13 : index
    %c8_9 = arith.constant 8 : index
    %14 = vector.load %arg7[%c13, %c8_9] : memref<16x120xf32, #tpu.memory_space<vmem>>, vector<3x8xf32>
    tpu.vector_store %arg7[%c13, %c8_9], %13 {strides = array<i32>} : memref<16x120xf32, #tpu.memory_space<vmem>>, vector<3x8xf32>,
    %15 = vector.extract_strided_slice %6 {offsets = [4, 0], sizes = [12, 8], strides = [1, 1]} : vector<16x8xf32> to vector<12x8xf32>
    %c0_10 = arith.constant 0 : index
    %c16 = arith.constant 16 : index
    %16 = vector.load %arg7[%c0_10, %c16] : memref<16x120xf32, #tpu.memory_space<vmem>>, vector<12x8xf32>
    tpu.vector_store %arg7[%c0_10, %c16], %15 {strides = array<i32>} : memref<16x120xf32, #tpu.memory_space<vmem>>, vector<12x8xf32>,
    %17 = vector.extract_strided_slice %1 {offsets = [0, 0], sizes = [4, 8], strides = [1, 1]} : vector<16x8xf32> to vector<4x8xf32>
    %c12 = arith.constant 12 : index
    %c16_11 = arith.constant 16 : index
    %18 = vector.load %arg7[%c12, %c16_11] : memref<16x120xf32, #tpu.memory_space<vmem>>, vector<4x8xf32>
    tpu.vector_store %arg7[%c12, %c16_11], %17 {strides = array<i32>} : memref<16x120xf32, #tpu.memory_space<vmem>>, vector<4x8xf32>,
    %19 = vector.extract_strided_slice %6 {offsets = [5, 0], sizes = [11, 8], strides = [1, 1]} : vector<16x8xf32> to vector<11x8xf32>
    %c0_12 = arith.constant 0 : index
    %c24 = arith.constant 24 : index
    %20 = vector.load %arg7[%c0_12, %c24] : memref<16x120xf32, #tpu.memory_space<vmem>>, vector<11x8xf32>
    tpu.vector_store %arg7[%c0_12, %c24], %19 {strides = array<i32>} : memref<16x120xf32, #tpu.memory_space<vmem>>, vector<11x8xf32>,
    %21 = vector.extract_strided_slice %1 {offsets = [0, 0], sizes = [5, 8], strides = [1, 1]} : vector<16x8xf32> to vector<5x8xf32>
    %c11 = arith.constant 11 : index
    %c24_13 = arith.constant 24 : index
    %22 = vector.load %arg7[%c11, %c24_13] : memref<16x120xf32, #tpu.memory_space<vmem>>, vector<5x8xf32>
    tpu.vector_store %arg7[%c11, %c24_13], %21 {strides = array<i32>} : memref<16x120xf32, #tpu.memory_space<vmem>>, vector<5x8xf32>,
    %23 = vector.extract_strided_slice %6 {offsets = [6, 0], sizes = [10, 8], strides = [1, 1]} : vector<16x8xf32> to vector<10x8xf32>
    %c0_14 = arith.constant 0 : index
    %c32 = arith.constant 32 : index
    %24 = vector.load %arg7[%c0_14, %c32] : memref<16x120xf32, #tpu.memory_space<vmem>>, vector<10x8xf32>
    tpu.vector_store %arg7[%c0_14, %c32], %23 {strides = array<i32>} : memref<16x120xf32, #tpu.memory_space<vmem>>, vector<10x8xf32>,
    %25 = vector.extract_strided_slice %1 {offsets = [0, 0], sizes = [6, 8], strides = [1, 1]} : vector<16x8xf32> to vector<6x8xf32>
    %c10 = arith.constant 10 : index
    %c32_15 = arith.constant 32 : index
    %26 = vector.load %arg7[%c10, %c32_15] : memref<16x120xf32, #tpu.memory_space<vmem>>, vector<6x8xf32>
    tpu.vector_store %arg7[%c10, %c32_15], %25 {strides = array<i32>} : memref<16x120xf32, #tpu.memory_space<vmem>>, vector<6x8xf32>,
    %27 = vector.extract_strided_slice %6 {offsets = [7, 0], sizes = [9, 8], strides = [1, 1]} : vector<16x8xf32> to vector<9x8xf32>
    %c0_16 = arith.constant 0 : index
    %c40 = arith.constant 40 : index
    %28 = vector.load %arg7[%c0_16, %c40] : memref<16x120xf32, #tpu.memory_space<vmem>>, vector<9x8xf32>
    tpu.vector_store %arg7[%c0_16, %c40], %27 {strides = array<i32>} : memref<16x120xf32, #tpu.memory_space<vmem>>, vector<9x8xf32>,
    %29 = vector.extract_strided_slice %1 {offsets = [0, 0], sizes = [7, 8], strides = [1, 1]} : vector<16x8xf32> to vector<7x8xf32>
    %c9 = arith.constant 9 : index
    %c40_17 = arith.constant 40 : index
    %30 = vector.load %arg7[%c9, %c40_17] : memref<16x120xf32, #tpu.memory_space<vmem>>, vector<7x8xf32>
    tpu.vector_store %arg7[%c9, %c40_17], %29 {strides = array<i32>} : memref<16x120xf32, #tpu.memory_space<vmem>>, vector<7x8xf32>,
    %31 = vector.extract_strided_slice %6 {offsets = [8, 0], sizes = [8, 8], strides = [1, 1]} : vector<16x8xf32> to vector<8x8xf32>
    %c0_18 = arith.constant 0 : index
    %c48 = arith.constant 48 : index
    %32 = vector.load %arg7[%c0_18, %c48] : memref<16x120xf32, #tpu.memory_space<vmem>>, vector<8x8xf32>
    tpu.vector_store %arg7[%c0_18, %c48], %31 {strides = array<i32>} : memref<16x120xf32, #tpu.memory_space<vmem>>, vector<8x8xf32>,
    %33 = vector.extract_strided_slice %1 {offsets = [0, 0], sizes = [8, 8], strides = [1, 1]} : vector<16x8xf32> to vector<8x8xf32>
    %c8_19 = arith.constant 8 : index
    %c48_20 = arith.constant 48 : index
    %34 = vector.load %arg7[%c8_19, %c48_20] : memref<16x120xf32, #tpu.memory_space<vmem>>, vector<8x8xf32>
    tpu.vector_store %arg7[%c8_19, %c48_20], %33 {strides = array<i32>} : memref<16x120xf32, #tpu.memory_space<vmem>>, vector<8x8xf32>,
    %35 = vector.extract_strided_slice %6 {offsets = [9, 0], sizes = [7, 8], strides = [1, 1]} : vector<16x8xf32> to vector<7x8xf32>
    %c0_21 = arith.constant 0 : index
    %c56 = arith.constant 56 : index
    %36 = vector.load %arg7[%c0_21, %c56] : memref<16x120xf32, #tpu.memory_space<vmem>>, vector<7x8xf32>
    tpu.vector_store %arg7[%c0_21, %c56], %35 {strides = array<i32>} : memref<16x120xf32, #tpu.memory_space<vmem>>, vector<7x8xf32>,
    %37 = vector.extract_strided_slice %1 {offsets = [0, 0], sizes = [9, 8], strides = [1, 1]} : vector<16x8xf32> to vector<9x8xf32>
    %c7 = arith.constant 7 : index
    %c56_22 = arith.constant 56 : index
    %38 = vector.load %arg7[%c7, %c56_22] : memref<16x120xf32, #tpu.memory_space<vmem>>, vector<9x8xf32>
    tpu.vector_store %arg7[%c7, %c56_22], %37 {strides = array<i32>} : memref<16x120xf32, #tpu.memory_space<vmem>>, vector<9x8xf32>,
    %39 = vector.extract_strided_slice %6 {offsets = [10, 0], sizes = [6, 8], strides = [1, 1]} : vector<16x8xf32> to vector<6x8xf32>
    %c0_23 = arith.constant 0 : index
    %c64 = arith.constant 64 : index
    %40 = vector.load %arg7[%c0_23, %c64] : memref<16x120xf32, #tpu.memory_space<vmem>>, vector<6x8xf32>
    tpu.vector_store %arg7[%c0_23, %c64], %39 {strides = array<i32>} : memref<16x120xf32, #tpu.memory_space<vmem>>, vector<6x8xf32>,
    %41 = vector.extract_strided_slice %1 {offsets = [0, 0], sizes = [10, 8], strides = [1, 1]} : vector<16x8xf32> to vector<10x8xf32>
    %c6 = arith.constant 6 : index
    %c64_24 = arith.constant 64 : index
    %42 = vector.load %arg7[%c6, %c64_24] : memref<16x120xf32, #tpu.memory_space<vmem>>, vector<10x8xf32>
    tpu.vector_store %arg7[%c6, %c64_24], %41 {strides = array<i32>} : memref<16x120xf32, #tpu.memory_space<vmem>>, vector<10x8xf32>,
    %43 = vector.extract_strided_slice %6 {offsets = [11, 0], sizes = [5, 8], strides = [1, 1]} : vector<16x8xf32> to vector<5x8xf32>
    %c0_25 = arith.constant 0 : index
    %c72 = arith.constant 72 : index
    %44 = vector.load %arg7[%c0_25, %c72] : memref<16x120xf32, #tpu.memory_space<vmem>>, vector<5x8xf32>
    tpu.vector_store %arg7[%c0_25, %c72], %43 {strides = array<i32>} : memref<16x120xf32, #tpu.memory_space<vmem>>, vector<5x8xf32>,
    %45 = vector.extract_strided_slice %1 {offsets = [0, 0], sizes = [11, 8], strides = [1, 1]} : vector<16x8xf32> to vector<11x8xf32>
    %c5 = arith.constant 5 : index
    %c72_26 = arith.constant 72 : index
    %46 = vector.load %arg7[%c5, %c72_26] : memref<16x120xf32, #tpu.memory_space<vmem>>, vector<11x8xf32>
    tpu.vector_store %arg7[%c5, %c72_26], %45 {strides = array<i32>} : memref<16x120xf32, #tpu.memory_space<vmem>>, vector<11x8xf32>,
    %47 = vector.extract_strided_slice %6 {offsets = [12, 0], sizes = [4, 8], strides = [1, 1]} : vector<16x8xf32> to vector<4x8xf32>
    %c0_27 = arith.constant 0 : index
    %c80 = arith.constant 80 : index
    %48 = vector.load %arg7[%c0_27, %c80] : memref<16x120xf32, #tpu.memory_space<vmem>>, vector<4x8xf32>
    tpu.vector_store %arg7[%c0_27, %c80], %47 {strides = array<i32>} : memref<16x120xf32, #tpu.memory_space<vmem>>, vector<4x8xf32>,
    %49 = vector.extract_strided_slice %1 {offsets = [0, 0], sizes = [12, 8], strides = [1, 1]} : vector<16x8xf32> to vector<12x8xf32>
    %c4 = arith.constant 4 : index
    %c80_28 = arith.constant 80 : index
    %50 = vector.load %arg7[%c4, %c80_28] : memref<16x120xf32, #tpu.memory_space<vmem>>, vector<12x8xf32>
    tpu.vector_store %arg7[%c4, %c80_28], %49 {strides = array<i32>} : memref<16x120xf32, #tpu.memory_space<vmem>>, vector<12x8xf32>,
    %51 = vector.extract_strided_slice %6 {offsets = [13, 0], sizes = [3, 8], strides = [1, 1]} : vector<16x8xf32> to vector<3x8xf32>
    %c0_29 = arith.constant 0 : index
    %c88 = arith.constant 88 : index
    %52 = vector.load %arg7[%c0_29, %c88] : memref<16x120xf32, #tpu.memory_space<vmem>>, vector<3x8xf32>
    tpu.vector_store %arg7[%c0_29, %c88], %51 {strides = array<i32>} : memref<16x120xf32, #tpu.memory_space<vmem>>, vector<3x8xf32>,
    %53 = vector.extract_strided_slice %1 {offsets = [0, 0], sizes = [13, 8], strides = [1, 1]} : vector<16x8xf32> to vector<13x8xf32>
    %c3 = arith.constant 3 : index
    %c88_30 = arith.constant 88 : index
    %54 = vector.load %arg7[%c3, %c88_30] : memref<16x120xf32, #tpu.memory_space<vmem>>, vector<13x8xf32>
    tpu.vector_store %arg7[%c3, %c88_30], %53 {strides = array<i32>} : memref<16x120xf32, #tpu.memory_space<vmem>>, vector<13x8xf32>,
    %55 = vector.extract_strided_slice %6 {offsets = [14, 0], sizes = [2, 8], strides = [1, 1]} : vector<16x8xf32> to vector<2x8xf32>
    %c0_31 = arith.constant 0 : index
    %c96 = arith.constant 96 : index
    %56 = vector.load %arg7[%c0_31, %c96] : memref<16x120xf32, #tpu.memory_space<vmem>>, vector<2x8xf32>
    tpu.vector_store %arg7[%c0_31, %c96], %55 {strides = array<i32>} : memref<16x120xf32, #tpu.memory_space<vmem>>, vector<2x8xf32>,
    %57 = vector.extract_strided_slice %1 {offsets = [0, 0], sizes = [14, 8], strides = [1, 1]} : vector<16x8xf32> to vector<14x8xf32>
    %c2 = arith.constant 2 : index
    %c96_32 = arith.constant 96 : index
    %58 = vector.load %arg7[%c2, %c96_32] : memref<16x120xf32, #tpu.memory_space<vmem>>, vector<14x8xf32>
    tpu.vector_store %arg7[%c2, %c96_32], %57 {strides = array<i32>} : memref<16x120xf32, #tpu.memory_space<vmem>>, vector<14x8xf32>,
    %59 = vector.extract_strided_slice %6 {offsets = [15, 0], sizes = [1, 8], strides = [1, 1]} : vector<16x8xf32> to vector<1x8xf32>
    %c0_33 = arith.constant 0 : index
    %c104 = arith.constant 104 : index
    %60 = vector.load %arg7[%c0_33, %c104] : memref<16x120xf32, #tpu.memory_space<vmem>>, vector<1x8xf32>
    tpu.vector_store %arg7[%c0_33, %c104], %59 {strides = array<i32>} : memref<16x120xf32, #tpu.memory_space<vmem>>, vector<1x8xf32>,
    %61 = vector.extract_strided_slice %1 {offsets = [0, 0], sizes = [15, 8], strides = [1, 1]} : vector<16x8xf32> to vector<15x8xf32>
    %c1 = arith.constant 1 : index
    %c104_34 = arith.constant 104 : index
    %62 = vector.load %arg7[%c1, %c104_34] : memref<16x120xf32, #tpu.memory_space<vmem>>, vector<15x8xf32>
    tpu.vector_store %arg7[%c1, %c104_34], %61 {strides = array<i32>} : memref<16x120xf32, #tpu.memory_space<vmem>>, vector<15x8xf32>,
    %c0_35 = arith.constant 0 : index
    %c112 = arith.constant 112 : index
    %63 = vector.load %arg7[%c0_35, %c112] : memref<16x120xf32, #tpu.memory_space<vmem>>, vector<16x8xf32>
    tpu.vector_store %arg7[%c0_35, %c112], %1 {strides = array<i32>} : memref<16x120xf32, #tpu.memory_space<vmem>>, vector<16x8xf32>,
    %c0_36 = arith.constant 0 : index
    %c0_37 = arith.constant 0 : index
    %64 = vector.load %arg7[%c0_36, %c0_37] : memref<16x120xf32, #tpu.memory_space<vmem>>, vector<16x120xf32>
    %c0_38 = arith.constant 0 : index
    %c0_39 = arith.constant 0 : index
    %65 = vector.load %arg4[%c0_38, %c0_39] : memref<120x32xf32, #tpu.memory_space<vmem>>, vector<120x32xf32>
    %cst_40 = arith.constant dense<0.000000e+00> : vector<16x32xf32>
    %66 = tpu.matmul %64, %65, %cst_40 {dimension_numbers = #tpu.dot_dimension_numbers<[1], [0], [0], [1], [0, 0, 1, 1], [], []>} : vector<16x120xf32>, vector<120x32xf32>, vector<16x32xf32> -> vector<16x32xf32>
    %c0_41 = arith.constant 0 : index
    %c0_42 = arith.constant 0 : index
    %67 = vector.load %arg5[%c0_41, %c0_42] : memref<8x32xf32, #tpu.memory_space<vmem>>, vector<1x32xf32>
    %68 = vector.broadcast %67 : vector<1x32xf32> to vector<16x32xf32>
    %69 = arith.addf %66, %68 : vector<16x32xf32>
    %cst_43 = arith.constant dense<0.000000e+00> : vector<16xf32>
    %70 = vector.multi_reduction <add>, %69, %cst_43 [1] : vector<16x32xf32> to vector<16xf32>
    %71 = vector.shape_cast %70 : vector<16xf32> to vector<16x1xf32>
    %cst_44 = arith.constant 3.200000e+01 : f32
    %72 = vector.broadcast %cst_44 : f32 to vector<16x1xf32>
    %73 = arith.divf %71, %72 : vector<16x1xf32>
    %74 = vector.broadcast %73 : vector<16x1xf32> to vector<16x32xf32>
    %75 = arith.subf %69, %74 : vector<16x32xf32>
    %76 = arith.mulf %75, %75 : vector<16x32xf32>
    %cst_45 = arith.constant dense<0.000000e+00> : vector<16xf32>
    %77 = vector.multi_reduction <add>, %76, %cst_45 [1] : vector<16x32xf32> to vector<16xf32>
    %78 = vector.shape_cast %77 : vector<16xf32> to vector<16x1xf32>
    %cst_46 = arith.constant 3.200000e+01 : f32
    %79 = vector.broadcast %cst_46 : f32 to vector<16x1xf32>
    %80 = arith.divf %78, %79 : vector<16x1xf32>
    %cst_47 = arith.constant 9.99999974E-6 : f32
    %81 = vector.broadcast %cst_47 : f32 to vector<16x1xf32>
    %82 = arith.addf %80, %81 : vector<16x1xf32>
    %83 = math.rsqrt %82 : vector<16x1xf32>
    %84 = vector.broadcast %83 : vector<16x1xf32> to vector<16x32xf32>
    %85 = arith.mulf %75, %84 : vector<16x32xf32>
    %c1_48 = arith.constant 1 : index
    %c0_49 = arith.constant 0 : index
    %86 = vector.load %arg5[%c1_48, %c0_49] : memref<8x32xf32, #tpu.memory_space<vmem>>, vector<1x32xf32>
    %87 = vector.broadcast %86 : vector<1x32xf32> to vector<16x32xf32>
    %88 = arith.mulf %85, %87 : vector<16x32xf32>
    %c2_50 = arith.constant 2 : index
    %c0_51 = arith.constant 0 : index
    %89 = vector.load %arg5[%c2_50, %c0_51] : memref<8x32xf32, #tpu.memory_space<vmem>>, vector<1x32xf32>
    %90 = vector.broadcast %89 : vector<1x32xf32> to vector<16x32xf32>
    %91 = arith.addf %88, %90 : vector<16x32xf32>
    %cst_52 = arith.constant 0.000000e+00 : f32
    %92 = vector.broadcast %cst_52 : f32 to vector<16x32xf32>
    %93 = arith.maximumf %91, %92 : vector<16x32xf32>
    %c0_53 = arith.constant 0 : index
    %c0_54 = arith.constant 0 : index
    %c0_55 = arith.constant 0 : index
    %94 = vector.load %arg6[%c0_53, %c0_54, %c0_55] : memref<1x16x32xf32, #tpu.memory_space<vmem>>, vector<1x16x32xf32>
    %95 = vector.shape_cast %94 : vector<1x16x32xf32> to vector<16x32xf32>
    %96 = vector.shape_cast %93 : vector<16x32xf32> to vector<1x16x32xf32>
    tpu.vector_store %arg6[%c0_53, %c0_54, %c0_55], %96 {strides = array<i32>} : memref<1x16x32xf32, #tpu.memory_space<vmem>>, vector<1x16x32xf32>,
    return
  }
  func.func @transform_0(%arg0: i32, %arg1: i32) -> (i32, i32, i32) {
    %c0_i32 = arith.constant 0 : i32
    %c0_i32_0 = arith.constant 0 : i32
    return %arg0, %arg1, %c0_i32 : i32, i32, i32
  }
  func.func @transform_1(%arg0: i32, %arg1: i32) -> (i32, i32, i32) {
    %c1_i32 = arith.constant 1 : i32
    %0 = arith.muli %arg1, %c1_i32 : i32
    %c1_i32_0 = arith.constant 1 : i32
    %1 = arith.subi %0, %c1_i32_0 : i32
    %c0_i32 = arith.constant 0 : i32
    %2 = arith.maxsi %1, %c0_i32 : i32
    %c0_i32_1 = arith.constant 0 : i32
    %c0_i32_2 = arith.constant 0 : i32
    return %arg0, %2, %c0_i32_1 : i32, i32, i32
  }
  func.func @transform_2(%arg0: i32, %arg1: i32) -> (i32, i32) {
    %c0_i32 = arith.constant 0 : i32
    %c0_i32_0 = arith.constant 0 : i32
    %c0_i32_1 = arith.constant 0 : i32
    return %c0_i32, %c0_i32_0 : i32, i32
  }
  func.func @transform_3(%arg0: i32, %arg1: i32) -> (i32, i32) {
    %c0_i32 = arith.constant 0 : i32
    %c0_i32_0 = arith.constant 0 : i32
    %c0_i32_1 = arith.constant 0 : i32
    return %c0_i32, %c0_i32_0 : i32, i32
  }
  func.func @transform_4(%arg0: i32, %arg1: i32) -> (i32, i32, i32) {
    %c0_i32 = arith.constant 0 : i32
    %c0_i32_0 = arith.constant 0 : i32
    return %arg0, %arg1, %c0_i32 : i32, i32, i32
  }
}

</mosaic_0001>

<bundles_post_ra>
// kernel: tpu_custom_call.1
= control target key start
LH: loop header
LB: loop body
LE: loop exit
PB: predicated region body
PF: predicated region fallthrough
CT: control target
= control target key end

     0   :  { %s1276_s15 = smov 0   ;;  %s1278_s16 = smov 0   ;;  %s1470_s0 = inlined_call_operand.vmem [shape: f32[2,40,8], index: 0, kind: input, shape index: {}]   ;;  %s1471_s1 = inlined_call_operand.vmem [shape: f32[2,40,8], index: 1, kind: input, shape index: {}]   ;;  %s1472_s2 = inlined_call_operand.vmem [shape: f32[120,32], index: 2, kind: input, shape index: {}]   ;;  %s1473_s3 = inlined_call_operand.vmem [shape: f32[8,32], index: 3, kind: input, shape index: {}]   ;;  %s1474_s4 = inlined_call_operand.vmem [shape: f32[2,40,32], index: 4, kind: output, shape index: {}]  }
   0x1   :  { %s1280_s17 = smov 0   ;;  %s1282_s18 = smov 0  }
   0x2   :  { %s1284_s19 = smov 0   ;;  %s1286_s20 = smov 0  }
   0x3   :  { %s1288_s21 = smov 0  }
   0x4 LB: > { %s23_s22 = sadd.s32 1, %s1194_s19  ;;  %s26_s23 = sadd.s32 1, %s1198_s20  ;;  %s1202_s21 = sphi %s1288_s21, %s14_s21   ;;  %s1198_s20 = sphi %s1286_s20, %s1481_s20   ;;  %s1194_s19 = sphi %s1284_s19, %s1480_s19   ;;  %s1190_s18 = sphi %s1282_s18, %s1479_s18   ;;  %s1186_s17 = sphi %s1280_s17, %s1478_s17   ;;  %s1182_s16 = sphi %s1278_s16, %s1477_s16   ;;  %s1178_s15 = sphi %s1276_s15, %s1476_s15  }
   0x5   : > { %p24_p0 = scmp.ge.s32.totalorder %s23_s22, 3  ;;  %s915_s24 = sadd.s32 4294967295, %s1202_s21  }
   0x6   : > { %p149_p1 = scmp.ne.s32.totalorder %s1182_s16, %s1178_s15  ;;  %p150_p2 = scmp.eq.s32.totalorder %s915_s24, 5 }
   0x7   : > { %s1483_s22 = smov (%p24_p0, %s23_s22), 0  ;;  %s1485_s23 = smov (!%p24_p0, %s26_s23), %s1198_s20 }
   0x8   : > { %s135_s25 = ssub.s32 %s1194_s19, %s1483_s22  ;;  %p28_p3 = scmp.ge.s32.totalorder %s1485_s23, 2 }
   0x9   : > { %p921_p4 = scmp.ge.s32.totalorder %s1202_s21, 1  ;;  %p1322_p5 = por %p150_p2, %p149_p1 }
   0xa   : > { %p228_p6 = scmp.lt.s32.totalorder %s1202_s21, 7  ;;  %s1487_s23 = smov (%p28_p3, %s1485_s23), 0 }
   0xb   : > { %s134_s27 = ssub.s32 %s1198_s20, %s1487_s23  ;;  %s139_s29 = sadd.s32 1, %s1182_s16 }
   0xc   : > { %p229_p7 = pnand %p921_p4, %p228_p6  ;;  %s136_s28 = sor.u32 %s135_s25, %s134_s27 }
   0xd   : > { %p137_p8 = scmp.eq.s32.totalorder %s136_s28, 0  ;;  %p282_p9 = scmp.lt.s32.totalorder (!%p229_p7), %s1190_s18, 1 }
   0xe   : > { %232 = sbr.rel (%p229_p7) target bundleno = 694 (0x2b6), region = 36  ;;  %s925_s5 = sadd.s32 (!%p229_p7), 4294967295, %s1186_s17 }
   0xf   : > { %s1333_s30 = scalar_select %p137_p8, %s1182_s16, %s139_s29  }
  0x10   : > { %p296_p10 = scmp.gt.s32.totalorder (!%p229_p7), %s925_s5, 0  ;;  %p328_p11 = scmp.eq.s32.totalorder (!%p229_p7), %s1186_s17, 0 }
  0x11   : > { %s1340_s9 = sshll.u32 (!%p229_p7), %s1186_s17, 1  ;;  %s1236_s27 = smov (!%p229_p7), 8  }
  0x12   : > { %p284_p13 = scmp.lt.s32.totalorder (!%p229_p7), %s1340_s9, 4  ;;  %s1241_s12 = smov (!%p229_p7), 48  }
  0x13   : > { %s283_s6 = scalar_select %p282_p9, %s1190_s18, 1  ;;  %vm334_vm0 = vcmask 64514   ;;  %vm336_vm1 = vcmask 64512   ;;  %vm338_vm2 = vcmask 58368   ;;  %vm348_vm3 = vcmask 130115   ;;  %v558_v23 = vld [vmem:[%s1472_s2 + $0x70] sm:$0xff] }
  0x14   : > { %s1489_s5 = smov (!%p296_p10, %s925_s5), 0  ;;  %s1242_s13 = smov 56   ;;  %vm356_vm4 = vcmask 124992   ;;  %vm350_vm5 = vcmask 130112   ;;  %vm366_vm6 = vcmask 195712   ;;  %vm371_vm7 = vcmask 191616   ;;  %569 = vmatpush.msra.mxu0 %v558_v23  ;;  %949 = vmatpush.msra.mxu1 %v558_v23 }
  0x15   : > { %s964_s7 = smul.u32 5, %s283_s6  ;;  %s926_s8 = sshll.u32 %s1489_s5, 1  ;;  %vm386_vm8 = vcmask 258240   ;;  %vm364_vm9 = vcmask 195716   ;;  %vm379_vm10 = vcmask 261317   ;;  %vm381_vm11 = vcmask 261312  }
  0x16   : > { %p305_p12 = scmp.lt.s32.totalorder %s926_s8, 4  ;;  %s1249_s5 = smov 112   ;;  %vm401_vm12 = vcmask 324864   ;;  %vm394_vm13 = vcmask 326918   ;;  %vm396_vm14 = vcmask 326912   ;;  %vm416_vm15 = vcmask 391488  }
  0x17   : > { %s1102_s24 = scalar_select %p328_p11, 0, 255  ;;  %v557_v24 = vld [vmem:[%s1472_s2 + $0x68] sm:$0xff]  ;;  %v556_v28 = vld [vmem:[%s1472_s2 + $0x60] sm:$0xff]  ;;  %v555_v29 = vld [vmem:[%s1472_s2 + $0x58] sm:$0xff] }
  0x18   : > { %s1491_s8 = smov (!%p305_p12, %s926_s8), 4  ;;  %570 = vmatpush.msra.mxu0 %v557_v24  ;;  %950 = vmatpush.msra.mxu1 %v557_v24  ;;  %v554_v30 = vld [vmem:[%s1472_s2 + $0x50] sm:$0xff]  ;;  %v553_v33 = vld [vmem:[%s1472_s2 + $0x48] sm:$0xff]  ;;  %v552_v35 = vld [vmem:[%s1472_s2 + $0x40] sm:$0xff] }
  0x19   : > { %s308_s10 = sadd.s32 %s964_s7, %s1491_s8  ;;  %s1237_s8 = smov 16   ;;  %v551_v36 = vld [vmem:[%s1472_s2 + $0x38] sm:$0xff]  ;;  %v550_v37 = vld [vmem:[%s1472_s2 + $0x30] sm:$0xff]  ;;  %v549_v40 = vld [vmem:[%s1472_s2 + $0x28] sm:$0xff] }
  0x1a   : > { %s927_s11 = sshll.u32 %s308_s10, 3  ;;  %s1238_s10 = smov 24   ;;  %571 = vmatpush.msra.mxu0 %v556_v28  ;;  %951 = vmatpush.msra.mxu1 %v556_v28  ;;  %v548_v42 = vld [vmem:[%s1472_s2 + $0x20] sm:$0xff]  ;;  %v547_v43 = vld [vmem:[%s1472_s2 + $0x18] sm:$0xff]  ;;  %v546_v44 = vld [vmem:[%s1472_s2 + $0x10] sm:$0xff] }
  0x1b   : > { %s310_s14 = scalar_lea.vmem %s1471_s1, %s927_s11  ;;  %s1239_s11 = smov 32   ;;  %v545_v46 = vld [vmem:[%s1472_s2 + $0x8] sm:$0xff]  ;;  %v544_v49 = vld [vmem:[%s1472_s2] sm:$0xff] }
  0x1c   : > { %v1103_v0 = vld [vmem:[%s310_s14] sm:%s1102_s24]  ;;  %s285_s25 = scalar_select %p284_p13, %s1340_s9, 4  ;;  %v1106_v2 = vld [vmem:[%s310_s14 + $0x8] sm:%s1102_s24]  ;;  %572 = vmatpush.msra.mxu0 %v555_v29  ;;  %952 = vmatpush.msra.mxu1 %v555_v29 }
  0x1d   : > { %342 = vrot.lane.b32.xlu0 %v1103_v0, %s1236_s27  ;;  %s1243_s14 = smov 64   ;;  %s1244_s24 = smov 72   ;;  %335 = vst.msk [vmem:[#allocation2 - $0x2] sm:$0xfc] %vm334_vm0, %v1103_v0  ;;  %vm409_vm0 = vcmask 392519  }
  0x1e   : > { %s287_s28 = sadd.s32 %s964_s7, %s285_s25  ;;  %s1240_s7 = smov 40   ;;  %337 = vst.msk [vmem:[#allocation2 + $0x6] sm:$0xff] %vm336_vm1, %v1106_v2  ;;  %vm411_vm1 = vcmask 392512   ;;  %573 = vmatpush.msra.mxu0 %v554_v30  ;;  %953 = vmatpush.msra.mxu1 %v554_v30  ;;  %v1107_v61 = vld [vmem:[%s1473_s3] ss:$0 sm:$0xff] }
  0x1f   : > { %s924_s29 = sshll.u32 %s287_s28, 3  ;;  %s1245_s25 = smov 80  }
  0x20   : > { %s289_s6 = scalar_lea.vmem %s1470_s0, %s924_s29  ;;  %s1247_s28 = smov 96   ;;  %574 = vmatpush.msra.mxu0 %v553_v33  ;;  %954 = vmatpush.msra.mxu1 %v553_v33 }
  0x21   : > { %v324_v1 = vld [vmem:[%s289_s6] sm:$0xff]  ;;  %v325_v3 = vld [vmem:[%s289_s6 + $0x8] sm:$0xff]  ;;  %s1248_s29 = smov 104  }
  0x22   : > { %353 = vrot.lane.b32.xlu1 %v324_v1, %s1236_s27  ;;  %368 = vrot.lane.b32.xlu2 %v324_v1, %s1237_s8  ;;  %339 = vst.msk [vmem:[#allocation2 + $0xe] sm:$0x3] %vm338_vm2, %v324_v1  ;;  %vm421_vm2 = vcmask 458112  }
  0x23   : > { %575 = vmatpush.msra.mxu0 %v552_v35  ;;  %955 = vmatpush.msra.mxu1 %v552_v35  ;;  %v1108_v35 = vld [vmem:[%s1473_s3 + $0x1] ss:$0 sm:$0xff] }
  0x25   : > { %344 = vrot.lane.b32.xlu0 %v1106_v2, %s1236_s27  ;;  %s1246_s27 = smov 88   ;;  %576 = vmatpush.msra.mxu0 %v551_v36 }
  0x26   : > { %956 = vmatpush.msra.mxu1 %v551_v36 }
  0x27   : > { %577 = vmatpush.msra.mxu0 %v550_v37 }
  0x28   : > { %957 = vmatpush.msra.mxu1 %v550_v37 }
  0x29   : > { %578 = vmatpush.msra.mxu0 %v549_v40 }
  0x2a   : > { %358 = vrot.lane.b32.xlu1 %v1103_v0, %s1237_s8  ;;  %360 = vrot.lane.b32.xlu2 %v1106_v2, %s1237_s8 }
  0x2b   : > { %958 = vmatpush.msra.mxu1 %v549_v40  ;;  %579 = vmatpush.msra.mxu0 %v548_v42 }
  0x2d   : > { %373 = vrot.lane.b32.xlu0 %v1103_v0, %s1238_s10  ;;  %959 = vmatpush.msra.mxu1 %v548_v42 }
  0x2e   : > { %580 = vmatpush.msra.mxu0 %v547_v43 }
  0x2f   : > { %960 = vmatpush.msra.mxu1 %v547_v43 }
  0x30   : > { %581 = vmatpush.msra.mxu0 %v546_v44 }
  0x31   : > { %961 = vmatpush.msra.mxu1 %v546_v44 }
  0x32   : > { %375 = vrot.lane.b32.xlu1 %v1106_v2, %s1238_s10  ;;  %383 = vrot.lane.b32.xlu2 %v324_v1, %s1238_s10 }
  0x33   : > { %582 = vmatpush.msra.mxu0 %v545_v46  ;;  %962 = vmatpush.msra.mxu1 %v545_v46 }
  0x35   : > { %388 = vrot.lane.b32.xlu0 %v1103_v0, %s1239_s11  ;;  %583 = vmatpush.msra.mxu0 %v544_v49 }
  0x36   : > { %963 = vmatpush.msra.mxu1 %v544_v49 }
  0x3a   : > { %390 = vrot.lane.b32.xlu1 %v1106_v2, %s1239_s11  ;;  %398 = vrot.lane.b32.xlu2 %v324_v1, %s1239_s11  ;;  %s274_s11 = sand.u32 1, %s1178_s15   ;;  %s663_s15 = ssub.s32 (%p1322_p5), 5, %s1340_s9 }
  0x3b   : > { %p664_p0 = scmp.lt.s32.totalorder (%p1322_p5), %s663_s15, 2 }
  0x3d   : > { %403 = vrot.lane.b32.xlu0 %v1103_v0, %s1240_s7 }
  0x42   : > { %405 = vrot.lane.b32.xlu1 %v1106_v2, %s1240_s7  ;;  %413 = vrot.lane.b32.xlu2 %v324_v1, %s1240_s7 }
  0x45   : > { %418 = vrot.lane.b32.xlu0 %v1106_v2, %s1241_s12 }
  0x4a   : > { %423 = vrot.lane.b32.xlu1 %v324_v1, %s1241_s12  ;;  %427 = vrot.lane.b32.xlu2 %v1106_v2, %s1242_s13 }
  0x4d   : > { %433 = vrot.lane.b32.xlu0 %v324_v1, %s1242_s13 }
  0x52   : > { %435 = vrot.lane.b32.xlu1 %v325_v3, %s1242_s13  ;;  %443 = vrot.lane.b32.xlu2 %v1106_v2, %s1243_s14  ;;  %s922_s13 = sshll.u32 %s274_s11, 4 }
  0x55   : > { %448 = vrot.lane.b32.xlu0 %v324_v1, %s1243_s14 }
  0x5a   : > { %450 = vrot.lane.b32.xlu1 %v325_v3, %s1243_s14  ;;  %458 = vrot.lane.b32.xlu2 %v1106_v2, %s1244_s24  ;;  %s1411_s14 = scalar_lea.vmem [#allocation3], %s922_s13  }
  0x5d   : > { %463 = vrot.lane.b32.xlu0 %v324_v1, %s1244_s24 }
  0x62   : > { %465 = vrot.lane.b32.xlu1 %v325_v3, %s1244_s24  ;;  %473 = vrot.lane.b32.xlu2 %v1106_v2, %s1245_s25  ;;  %s965_s24 = smul.u32 (%p1322_p5), 5, %s1190_s18 }
  0x65   : > { %478 = vrot.lane.b32.xlu0 %v324_v1, %s1245_s25 }
  0x6a   : > { %480 = vrot.lane.b32.xlu1 %v325_v3, %s1245_s25  ;;  %488 = vrot.lane.b32.xlu2 %v1106_v2, %s1246_s27  ;;  %s669_s25 = sadd.s32 (%p1322_p5), %s965_s24, %s1340_s9 }
  0x6d   : > { %493 = vrot.lane.b32.xlu0 %v324_v1, %s1246_s27 }
  0x72   : > { %495 = vrot.lane.b32.xlu1 %v325_v3, %s1246_s27  ;;  %503 = vrot.lane.b32.xlu2 %v1106_v2, %s1247_s28  ;;  %s934_s27 = sshll.u32 (%p1322_p5), %s669_s25, 3 }
  0x73   : > { %s1428_s17 = scalar_lea.vmem (%p1322_p5), %s1474_s4, %s934_s27  }
  0x75   : > { %508 = vrot.lane.b32.xlu0 %v324_v1, %s1247_s28 }
  0x7a   : > { %510 = vrot.lane.b32.xlu1 %v325_v3, %s1247_s28  ;;  %518 = vrot.lane.b32.xlu2 %v1106_v2, %s1248_s29 }
  0x7c   : > { %v369_v4 = vpop.permute.xlu2 %368 }
  0x7d   : > { %523 = vrot.lane.b32.xlu0 %v324_v1, %s1248_s29 }
  0x82   : > { %525 = vrot.lane.b32.xlu1 %v325_v3, %s1248_s29  ;;  %533 = vrot.lane.b32.xlu2 %v324_v1, %s1249_s5 }
  0x84   : > { %v361_v5 = vpop.permute.xlu2 %360 }
  0x85   : > { %535 = vrot.lane.b32.xlu0 %v325_v3, %s1249_s5 }
  0x8c   : > { %v384_v6 = vpop.permute.xlu2 %383 }
  0x8f   : > { %v343_v7 = vpop.permute.xlu0 %342 }
  0x90   : > { %349 = vst.msk [vmem:[#allocation2 - $0x3] sm:$0xf8] %vm348_vm3, %v343_v7  ;;  %vm430_vm3 = vcmask 523713  }
  0x94   : > { %v354_v8 = vpop.permute.xlu1 %353  ;;  %v399_v9 = vpop.permute.xlu2 %398 }
  0x95   : > { %357 = vst.msk [vmem:[#allocation2 + $0xd] sm:$0x7] %vm356_vm4, %v354_v8  ;;  %vm446_vm4 = vcmask 589314  }
  0x97   : > { %v345_v10 = vpop.permute.xlu0 %344 }
  0x98   : > { %351 = vst.msk [vmem:[#allocation2 + $0x5] sm:$0xff] %vm350_vm5, %v345_v10  ;;  %vm461_vm5 = vcmask 654915  }
  0x99   : > { %367 = vst.msk [vmem:[#allocation2 + $0x4] sm:$0xff] %vm366_vm6, %v361_v5  ;;  %vm476_vm6 = vcmask 720516  }
  0x9a   : > { %372 = vst.msk [vmem:[#allocation2 + $0xc] sm:$0xf] %vm371_vm7, %v369_v4  ;;  %vm439_vm7 = vcmask 523712   ;;  %v1250_v4 = vmov 32.0  }
  0x9b   : > { %387 = vst.msk [vmem:[#allocation2 + $0xb] sm:$0x1f] %vm386_vm8, %v384_v6  ;;  %vm441_vm8 = vcmask 516544   ;;  %1110 = vrcp.f32 %v1250_v4 }
  0x9c   : > { %v359_v11 = vpop.permute.xlu1 %358  ;;  %v414_v12 = vpop.permute.xlu2 %413 }
  0x9d   : > { %365 = vst.msk [vmem:[#allocation2 - $0x4] sm:$0xf0] %vm364_vm9, %v359_v11  ;;  %vm491_vm9 = vcmask 786117  }
  0x9f   : > { %v374_v13 = vpop.permute.xlu0 %373 }
  0xa0   : > { %380 = vst.msk [vmem:[#allocation2 - $0x5] sm:$0xe0] %vm379_vm10, %v374_v13  ;;  %vm454_vm10 = vcmask 589312  }
  0xa1   : > { %v1111_v5 = vpop.eup %1110 }
  0xa2   : > { %v599_v6 = vmul.f32 32.0, %v1111_v5 }
  0xa4   : > { %v376_v14 = vpop.permute.xlu1 %375  ;;  %v428_v15 = vpop.permute.xlu2 %427  ;;  %v600_v7 = vsub.f32 1.0, %v599_v6 }
  0xa5   : > { %382 = vst.msk [vmem:[#allocation2 + $0x3] sm:$0xff] %vm381_vm11, %v376_v14  ;;  %vm456_vm11 = vcmask 583168  }
  0xa6   : > { %402 = vst.msk [vmem:[#allocation2 + $0xa] sm:$0x3f] %vm401_vm12, %v399_v9  ;;  %vm506_vm12 = vcmask 851718   ;;  %v601_v8 = vmul.f32 %v1111_v5, %v600_v7 }
  0xa7   : > { %v389_v16 = vpop.permute.xlu0 %388 }
  0xa8   : > { %395 = vst.msk [vmem:[#allocation2 - $0x6] sm:$0xc0] %vm394_vm13, %v389_v16  ;;  %vm469_vm13 = vcmask 654912   ;;  %v602_v9 = vadd.f32 %v1111_v5, %v601_v8 }
  0xac   : > { %v391_v17 = vpop.permute.xlu1 %390  ;;  %v444_v18 = vpop.permute.xlu2 %443 }
  0xad   : > { %397 = vst.msk [vmem:[#allocation2 + $0x2] sm:$0xff] %vm396_vm14, %v391_v17  ;;  %vm471_vm14 = vcmask 649792  }
  0xae   : > { %417 = vst.msk [vmem:[#allocation2 + $0x9] sm:$0x7f] %vm416_vm15, %v414_v12  ;;  %vm521_vm15 = vcmask 917319  }
  0xaf   : > { %v404_v19 = vpop.permute.xlu0 %403 }
  0xb0   : > { %410 = vst.msk [vmem:[#allocation2 - $0x7] sm:$0x80] %vm409_vm0, %v404_v19  ;;  %vm484_vm0 = vcmask 720512  }
  0xb4   : > { %v406_v20 = vpop.permute.xlu1 %405  ;;  %v459_v21 = vpop.permute.xlu2 %458 }
  0xb5   : > { %412 = vst.msk [vmem:[#allocation2 + $0x1] sm:$0xff] %vm411_vm1, %v406_v20  ;;  %vm486_vm1 = vcmask 716416  }
  0xb7   : > { %v419_v22 = vpop.permute.xlu0 %418 }
  0xb8   : > { %422 = vst.msk [vmem:[#allocation2] sm:$0xff] %vm421_vm2, %v419_v22 }
  0xb9   : > { %431 = vst.msk [vmem:[#allocation2 - $0x1] sm:$0xfe] %vm430_vm3, %v428_v15  ;;  %vm501_vm3 = vcmask 783040  }
  0xba   : > { %447 = vst.msk [vmem:[#allocation2 - $0x2] sm:$0xfc] %vm446_vm4, %v444_v18  ;;  %vm514_vm4 = vcmask 851712  }
  0xbb   : > { %462 = vst.msk [vmem:[#allocation2 - $0x3] sm:$0xf8] %vm461_vm5, %v459_v21  ;;  %vm516_vm5 = vcmask 849664  }
  0xbc   : > { %v424_v25 = vpop.permute.xlu1 %423  ;;  %v474_v26 = vpop.permute.xlu2 %473 }
  0xbd   : > { %426 = vst.msk [vmem:[#allocation2 + $0x8] sm:$0xff] %vm421_vm2, %v424_v25  ;;  %vm499_vm2 = vcmask 786112  }
  0xbe   : > { %477 = vst.msk [vmem:[#allocation2 - $0x4] sm:$0xf0] %vm476_vm6, %v474_v26  ;;  %vm529_vm6 = vcmask 917312  }
  0xbf   : > { %v434_v27 = vpop.permute.xlu0 %433 }
  0xc0   : > { %440 = vst.msk [vmem:[#allocation2 + $0x7] sm:$0xff] %vm439_vm7, %v434_v27  ;;  %vm539_vm7 = vcmask 982912  }
  0xc4   : > { %v436_v31 = vpop.permute.xlu1 %435  ;;  %v489_v32 = vpop.permute.xlu2 %488 }
  0xc5   : > { %442 = vst.msk [vmem:[#allocation2 + $0xf] sm:$0x1] %vm441_vm8, %v436_v31  ;;  %vm531_vm8 = vcmask 916288  }
  0xc6   : > { %492 = vst.msk [vmem:[#allocation2 - $0x5] sm:$0xe0] %vm491_vm9, %v489_v32  ;;  %vm561_vm9 = vcmask 982016  }
  0xc7   : > { %v449_v34 = vpop.permute.xlu0 %448 }
  0xc8   : > { %455 = vst.msk [vmem:[#allocation2 + $0x6] sm:$0xff] %vm454_vm10, %v449_v34  ;;  %vm591_vm10 = vcmask 261120  }
  0xcc   : > { %v451_v38 = vpop.permute.xlu1 %450  ;;  %v504_v39 = vpop.permute.xlu2 %503 }
  0xcd   : > { %457 = vst.msk [vmem:[#allocation2 + $0xe] sm:$0x3] %vm456_vm11, %v451_v38  ;;  %vm603_vm11 = vweird.f32 %v1111_v5  ;;  %v1109_v38 = vld [vmem:[%s1473_s3 + $0x2] ss:$0 sm:$0xff] }
  0xce   : > { %507 = vst.msk [vmem:[#allocation2 - $0x6] sm:$0xc0] %vm506_vm12, %v504_v39  ;;  %v604_v10 = vsel %vm603_vm11, %v1111_v5, %v602_v9 }
  0xcf   : > { %v464_v41 = vpop.permute.xlu0 %463 }
  0xd0   : > { %470 = vst.msk [vmem:[#allocation2 + $0x5] sm:$0xff] %vm469_vm13, %v464_v41 }
  0xd4   : > { %v466_v45 = vpop.permute.xlu1 %465  ;;  %v519_v47 = vpop.permute.xlu2 %518 }
  0xd5   : > { %472 = vst.msk [vmem:[#allocation2 + $0xd] sm:$0x7] %vm471_vm14, %v466_v45 }
  0xd6   : > { %522 = vst.msk [vmem:[#allocation2 - $0x7] sm:$0x80] %vm521_vm15, %v519_v47 }
  0xd7   : > { %v479_v48 = vpop.permute.xlu0 %478 }
  0xd8   : > { %485 = vst.msk [vmem:[#allocation2 + $0x4] sm:$0xff] %vm484_vm0, %v479_v48 }
  0xdc   : > { %v481_v50 = vpop.permute.xlu1 %480  ;;  %v534_v55 = vpop.permute.xlu2 %533 }
  0xdd   : > { %487 = vst.msk [vmem:[#allocation2 + $0xc] sm:$0xf] %vm486_vm1, %v481_v50 }
  0xdf   : > { %v494_v51 = vpop.permute.xlu0 %493 }
  0xe0   : > { %500 = vst.msk [vmem:[#allocation2 + $0x3] sm:$0xff] %vm499_vm2, %v494_v51 }
  0xe4   : > { %v496_v52 = vpop.permute.xlu1 %495 }
  0xe5   : > { %502 = vst.msk [vmem:[#allocation2 + $0xb] sm:$0x1f] %vm501_vm3, %v496_v52 }
  0xe7   : > { %v509_v53 = vpop.permute.xlu0 %508 }
  0xe8   : > { %515 = vst.msk [vmem:[#allocation2 + $0x2] sm:$0xff] %vm514_vm4, %v509_v53 }
  0xec   : > { %v511_v54 = vpop.permute.xlu1 %510 }
  0xed   : > { %517 = vst.msk [vmem:[#allocation2 + $0xa] sm:$0x3f] %vm516_vm5, %v511_v54 }
  0xef   : > { %v524_v56 = vpop.permute.xlu0 %523 }
  0xf0   : > { %530 = vst.msk [vmem:[#allocation2 + $0x1] sm:$0xff] %vm529_vm6, %v524_v56 }
  0xf1   : > { %540 = vst.msk [vmem:[#allocation2] sm:$0xff] %vm539_vm7, %v534_v55 }
  0xf4   : > { %v526_v57 = vpop.permute.xlu1 %525 }
  0xf5   : > { %532 = vst.msk [vmem:[#allocation2 + $0x9] sm:$0x7f] %vm531_vm8, %v526_v57 }
  0xf7   : > { %v536_v58 = vpop.permute.xlu0 %535 }
  0xf8   : > { %541 = vst.msk [vmem:[#allocation2 + $0x8] sm:$0xff] %vm539_vm7, %v536_v58  ;;  %v542_v59 = vld [vmem:[#allocation2] sm:$0xff] }
  0xf9   : > { %928 = vmatmul.msk.f32.vlgmr.msra.gmra.mxu0 %vm561_vm9, %v542_v59 }
  0xff   : > { %v543_v60 = vld [vmem:[#allocation2 + $0x8] sm:$0xff] }
 0x100   : > { %929 = vmatmul.msk.f32.vlgmr.msra.gmra.mxu1 %vm561_vm9, %v543_v60 }
 0x176   : > { %v585_v62 = vpop.f32.mrf.mxu0 }
 0x177   : > { %v586_v63 = vadd.f32 %v1107_v61, %v585_v62 }
 0x179   : > { %v592_v0 = vsel %vm591_vm10, %v586_v63, 0.0 }
 0x17a   : > { %593 = vadd.xlane.f32.xlu1 %v592_v0 }
 0x17d   : > { %v588_v1 = vpop.f32.mrf.mxu1 }
 0x17e   : > { %v589_v2 = vadd.f32 %v1107_v61, %v588_v1 }
 0x180   : > { %v595_v3 = vsel %vm591_vm10, %v589_v2, 0.0 }
 0x181   : > { %596 = vadd.xlane.f32.xlu2 %v595_v3 }
 0x1ed   : > { %v594_v11 = vpop.xlane.xlu1 %593 }
 0x1ee   : > { %v605_v12 = vmul.f32 %v604_v10, %v594_v11 }
 0x1f0   : > { %v607_v13 = vsub.f32 %v586_v63, %v605_v12 }
 0x1f2   : > { %v609_v14 = vmul.f32 %v607_v13, %v607_v13 }
 0x1f4   : > { %v597_v15 = vpop.xlane.xlu2 %596  ;;  %v611_v16 = vsel %vm591_vm10, %v609_v14, 0.0 }
 0x1f5   : > { %v606_v17 = vmul.f32 %v604_v10, %v597_v15  ;;  %612 = vadd.xlane.f32.xlu0 %v611_v16 }
 0x1f7   : > { %v608_v18 = vsub.f32 %v589_v2, %v606_v17 }
 0x1f9   : > { %v610_v19 = vmul.f32 %v608_v18, %v608_v18 }
 0x1fb   : > { %v614_v20 = vsel %vm591_vm10, %v610_v19, 0.0 }
 0x1fc   : > { %615 = vadd.xlane.f32.xlu2 %v614_v20 }
 0x268   : > { %v613_v21 = vpop.xlane.xlu0 %612 }
 0x269   : > { %v617_v22 = vmul.f32 %v613_v21, %v604_v10 }
 0x26b   : > { %v619_v23 = vadd.f32 1e-05, %v617_v22 }
 0x26d   : > { %1112 = vrsqrt.f32 %v619_v23  ;;  %vm627_vm13 = vweird.f32 %v619_v23 }
 0x26f   : > { %v616_v24 = vpop.xlane.xlu2 %615 }
 0x270   : > { %v618_v25 = vmul.f32 %v616_v24, %v604_v10 }
 0x272   : > { %v620_v26 = vadd.f32 1e-05, %v618_v25 }
 0x273   : > { %v1113_v27 = vpop.eup %1112 }
 0x274   : > { %v622_v28 = vmul.f32 %v1113_v27, %v619_v23  ;;  %1114 = vrsqrt.f32 %v620_v26  ;;  %vm628_vm12 = vweird.f32 %v1113_v27  ;;  %vm637_vm0 = vweird.f32 %v620_v26 }
 0x275   : > { %vm629_vm14 = vmor %vm627_vm13, %vm628_vm12 }
 0x276   : > { %v623_v29 = vmul.f32 %v1113_v27, %v622_v28 }
 0x278   : > { %v624_v30 = vmul.f32 0.5, %v623_v29 }
 0x27a   : > { %v1115_v31 = vpop.eup %1114  ;;  %v625_v32 = vsub.f32 1.5, %v624_v30 }
 0x27b   : > { %v632_v33 = vmul.f32 %v1115_v31, %v620_v26  ;;  %vm638_vm15 = vweird.f32 %v1115_v31 }
 0x27c   : > { %v626_v34 = vmul.f32 %v1113_v27, %v625_v32  ;;  %vm639_vm1 = vmor %vm637_vm0, %vm638_vm15 }
 0x27d   : > { %v633_v36 = vmul.f32 %v1115_v31, %v632_v33 }
 0x27e   : > { %v630_v37 = vsel %vm629_vm14, %v1113_v27, %v626_v34 }
 0x27f   : > { %v641_v39 = vmul.f32 %v630_v37, %v607_v13  ;;  %v634_v40 = vmul.f32 0.5, %v633_v36 }
 0x281   : > { %v645_v41 = vmul.f32 %v1108_v35, %v641_v39  ;;  %v635_v42 = vsub.f32 1.5, %v634_v40 }
 0x283   : > { %v649_v43 = vadd.f32 %v1109_v38, %v645_v41  ;;  %v636_v44 = vmul.f32 %v1115_v31, %v635_v42 }
 0x285   : > { %v651_v45 = vmax.f32 %v649_v43, 0.0  ;;  %v640_v46 = vsel %vm639_vm1, %v1115_v31, %v636_v44 }
 0x286   : > { %v642_v47 = vmul.f32 %v640_v46, %v608_v18 }
 0x287   : > { %653 = vst.msk [vmem:[%s1411_s14] sm:$0xff] %vm591_vm10, %v651_v45 }
 0x288   : > { %v646_v48 = vmul.f32 %v1108_v35, %v642_v47 }
 0x28a   : > { %v650_v49 = vadd.f32 %v1109_v38, %v646_v48  ;;  %661 = sbr.rel (!%p1322_p5) target bundleno = 694 (0x2b6), region = 40 }
 0x28c   : > { %v652_v50 = vmax.f32 %v650_v49, 0.0 }
 0x28e   : > { %654 = vst.msk [vmem:[%s1411_s14 + $0x8] sm:$0xff] %vm591_vm10, %v652_v50 }
 0x28f   : > { %s1493_s15 = smov (!%p664_p0, %s663_s15), 2 }
 0x290   : > { %s932_s28 = sshll.u32 %s1493_s15, 3 }
 0x291   : > { %p935_p1 = scmp.eq.s32.totalorder %s932_s28, 0 }
 0x292   : > { %s1431_s26 = sshrl.u32 (!%p935_p1), %s1493_s15, 1 }
 0x293   : > { %674 = sbr.rel (%p935_p1) target bundleno = 694 (0x2b6), region = 44  ;;  %p936_p2 = scmp.le.s32.totalorder (!%p935_p1), %s1431_s26, 0 }
 0x298   : > { %854 = sbr.rel (%p936_p2) target bundleno = 677 (0x2a5), region = 123  ;;  %s1204_s18 = smov (!%p936_p2), %s1428_s17  }
 0x299   : > { %s1208_s9 = smov (!%p936_p2), %s1411_s14   ;;  %s1212_s6 = smov (!%p936_p2), 0  }
 0x29a   : > { %s1216_s8 = smov (!%p936_p2), 0  }
 0x29d LB: >> { %v739_v51 = vld [vmem:[%s1210_s9] sm:$0xff]  ;;  %v741_v52 = vld [vmem:[%s1210_s9 + $0x8] sm:$0xff]  ;;  %s743_s10 = sadd.s32 1, %s1214_s6  ;;  %s733_s8 = sadd.s32 1, %s1218_s8   ;;  %s1218_s8 = sphi %s1216_s8, %s733_s8   ;;  %s1214_s6 = sphi %s1212_s6, %s1213_s6   ;;  %s1210_s9 = sphi %s1208_s9, %s748_s9   ;;  %s1206_s18 = sphi %s1204_s18, %s749_s18  }
 0x29e   : >> { %740 = vst [vmem:[%s1206_s18] sm:$0xff] %v739_v51  ;;  %p744_p3 = scmp.ge.s32.totalorder %s743_s10, %s1431_s26  ;;  %p732_p4 = scmp.ge.s32.totalorder %s733_s8, %s1431_s26 }
 0x29f   : >> { %742 = vst [vmem:[%s1206_s18 + $0x8] sm:$0xff] %v741_v52 }
 0x2a0   : >> { %s1495_s10 = smov (%p744_p3, %s743_s10), 0  ;;  %735 = sbr.rel (!%p732_p4) target bundleno = 669 (0x29d), region = 129 }
 0x2a1   : >> { %s937_s11 = sshll.u32 %s1495_s10, 4  ;;  %s1213_s6 = smov %s1495_s10  }
 0x2a2   : >> { %s748_s9 = scalar_lea.vmem %s1411_s14, %s937_s11 [#allocation3]   ;;  %s749_s18 = scalar_lea.vmem %s1428_s17, %s937_s11  }
 0x2a5 PF: > { %s1441_s7 = sand.u32 1, %s1493_s15   ;;  %s947_s12 = sshll.u32 %s1431_s26, 4 }
 0x2a6   : > { %s754_s13 = scalar_lea.vmem %s1411_s14, %s947_s12 [#allocation3]   ;;  %s756_s24 = scalar_lea.vmem %s1428_s17, %s947_s12  }
 0x2a7   : > { %p942_p5 = scmp.le.s32.totalorder %s1441_s7, 0 }
 0x2a8   : > { %s1220_s25 = smov (!%p942_p5), %s756_s24   ;;  %s1224_s27 = smov (!%p942_p5), %s754_s13  }
 0x2a9   : > { %868 = sbr.rel (%p942_p5) target bundleno = 694 (0x2b6), region = 134  ;;  %s1228_s28 = smov (!%p942_p5), 0  }
 0x2aa   : > { %s1232_s29 = smov (!%p942_p5), 0  }
 0x2ae LB: >> { %v766_v53 = vld [vmem:[%s1226_s27] sm:$0xff]  ;;  %s768_s15 = sadd.s32 1, %s1230_s28  ;;  %s760_s29 = sadd.s32 1, %s1234_s29   ;;  %s1234_s29 = sphi %s1232_s29, %s760_s29   ;;  %s1230_s28 = sphi %s1228_s28, %s1229_s28   ;;  %s1226_s27 = sphi %s1224_s27, %s773_s27   ;;  %s1222_s25 = sphi %s1220_s25, %s774_s25  }
 0x2af   : >> { %767 = vst [vmem:[%s1222_s25] sm:$0xff] %v766_v53  ;;  %p769_p6 = scmp.ge.s32.totalorder %s768_s15, %s1441_s7  ;;  %p759_p7 = scmp.ge.s32.totalorder %s760_s29, %s1441_s7 }
 0x2b1   : >> { %s1497_s15 = smov (%p769_p6, %s768_s15), 0  ;;  %762 = sbr.rel (!%p759_p7) target bundleno = 686 (0x2ae), region = 140 }
 0x2b2   : >> { %s943_s14 = sshll.u32 %s1497_s15, 3  ;;  %s1229_s28 = smov %s1497_s15  }
 0x2b3   : >> { %s773_s27 = scalar_lea.vmem %s754_s13, %s943_s14 [#allocation3]   ;;  %s774_s25 = scalar_lea.vmem %s756_s24, %s943_s14  }
 0x2b6 PF: > { %s14_s21 = sadd.s32 1, %s1202_s21   ;;  %s1476_s15 = smov %s1182_s16 }
 0x2b7   : > { %p11_p8 = scmp.ge.s32.totalorder %s14_s21, 8   ;;  %s1477_s16 = smov %s1333_s30 }
 0x2b8   : > { %s1478_s17 = smov %s1194_s19  ;;  %s1479_s18 = smov %s1198_s20 }
 0x2b9   : > { %s1480_s19 = smov %s1483_s22  ;;  %s1481_s20 = smov %s1487_s23 }
 0x2ba   :  { %13 = sbr.rel (!%p11_p8) target bundleno = 4 (0x4), region = 151 }

</bundles_post_ra>
